<compile_context>
chip_gen: v7x
topology: tpu7x:2x2x1
jax: 0.10.0
libtpu: 0.0.40
codegen_flags: <defaults>
</compile_context>

<pallas_src>
import jax
import jax.numpy as jnp
from jax.experimental import pallas as pl
from jax.experimental.pallas import tpu as pltpu


def _round_up(x, m):
    return ((x + m - 1) // m) * m


def _cdiv(a, b):
    return -(-a // b)


def _vmem_tile_bytes(rows, cols, dtype_bytes):
    """VMEM footprint of a (rows, cols) tile incl. lane/sublane padding."""
    sublane_pack = 8 * (4 // dtype_bytes)          # 8 rows for f32, 16 for bf16
    return (_round_up(max(rows, 1), sublane_pack)
            * _round_up(max(cols, 1), 128) * dtype_bytes)


def _vmem_budget_bytes():
    """Generation-aware scoped-VMEM budget: ~half of physical, capped at 64 MiB.

    v7x (64 MiB/TC) -> 32 MiB; v5e/v6e (128 MiB) -> 64 MiB; fallback 32 MiB.
    """
    try:
        info = pltpu.get_tpu_info()
        phys = int(getattr(info, "vmem_capacity_bytes", 64 * 1024 * 1024))
    except Exception:
        phys = 64 * 1024 * 1024
    return int(min(phys // 2, 64 * 1024 * 1024))


def _pipeline_footprint(tile_m, Kdim, OC_pad):
    # Every BlockSpec input/output is double-buffered by the pipeline.
    return (2 * _vmem_tile_bytes(tile_m, Kdim, 2)       # bf16 patch tile
            + 2 * _vmem_tile_bytes(Kdim, OC_pad, 2)     # bf16 weights (resident)
            + 2 * _vmem_tile_bytes(1, OC_pad, 4)        # f32 folded BN shift
            + 2 * _vmem_tile_bytes(tile_m, OC_pad, 2))  # bf16 output tile


def _pick_tile_m(M, Kdim, OC_pad, budget):
    """Largest 16-aligned M tile fitting the VMEM budget.

    Prefers an even grid length >= 2 so the "parallel" M axis splits across
    both TensorCores on v7x; on single-TC chips this simply amortizes the
    ~0.35 us/step grid overhead with the biggest tile that fits.
    """
    cands = [t for t in (8192, 4096, 2048, 1024, 512, 256, 128, 64, 32, 16)
             if t <= _round_up(M, 16)]
    if not cands:
        cands = [16]
    fitting = [t for t in cands
               if _pipeline_footprint(t, Kdim, OC_pad) <= 0.75 * budget]
    if not fitting:
        fitting = [cands[-1]]
    for t in fitting:                                   # largest first
        g = _cdiv(M, t)
        if g >= 2 and g % 2 == 0:
            return t
    for t in fitting:
        if _cdiv(M, t) >= 2:
            return t
    return fitting[0]


def conv_bn_relu_kernel(p_ref, w_ref, shift_ref, o_ref):
    # p_ref:     (TILE_M, Kdim)    bf16 im2col patch tile
    # w_ref:     (Kdim, OC_pad)    bf16 conv weight with BN scale pre-folded
    # shift_ref: (1, OC_pad)       f32  beta + (conv_bias - mean) * scale
    # o_ref:     (TILE_M, OC_pad)  bf16 output tile
    acc = jnp.dot(p_ref[...], w_ref[...], preferred_element_type=jnp.float32)
    o_ref[...] = jnp.maximum(acc + shift_ref[...], 0.0).astype(o_ref.dtype)


def basic_conv_forward(x_nchw, weight, conv_bias, gamma, beta,
                       running_mean, running_var, eps=1e-5, tile_m=None):
    N, C, H, W = x_nchw.shape
    OC, _, K, _ = weight.shape
    OH, OW = H - K + 1, W - K + 1          # stride=1, padding=0 (Conv2d defaults)

    # ---- glue: layout + im2col (plain JAX, bf16 to halve HBM traffic) ----
    x = jnp.transpose(x_nchw, (0, 2, 3, 1)).astype(jnp.bfloat16)   # NCHW -> NHWC
    cols = []
    for di in range(K):
        for dj in range(K):
            cols.append(x[:, di:di + OH, dj:dj + OW, :])
    # (N, OH, OW, K*K*C) with channel-fastest inside each (di, dj)
    patches = jnp.concatenate(cols, axis=-1).reshape(N * OH * OW, K * K * C)

    # weight (OC, C, K, K) -> (K, K, C, OC) -> (K*K*C, OC) matching patch order.
    # Fold the eval-mode BN scale into the weights in f32 *before* the bf16
    # cast, so the kernel epilogue is only add + ReLU.
    scale = (gamma / jnp.sqrt(running_var + eps)).astype(jnp.float32)
    w_mat = jnp.transpose(weight, (2, 3, 1, 0)).reshape(K * K * C, OC)
    w_mat = (w_mat.astype(jnp.float32) * scale[None, :]).astype(jnp.bfloat16)
    shift = (beta + (conv_bias - running_mean) * scale).astype(jnp.float32)

    Kdim = K * K * C
    M = N * OH * OW

    # Lane-dense output channels: 128 quantum (full v5e MXU N dimension); once
    # OC exceeds 128, round to 256 to fill the 2x256-wide MXU N tile on v6e/v7x.
    OC_pad = 128 if OC <= 128 else _round_up(OC, 256)

    budget = _vmem_budget_bytes()
    if tile_m is None:
        tile_m = _pick_tile_m(M, Kdim, OC_pad, budget)
    assert tile_m % 16 == 0, "tile_m must be a multiple of 16 (bf16 sublane pack)"

    M_pad = _round_up(M, tile_m)
    if M_pad != M:
        patches = jnp.pad(patches, ((0, M_pad - M), (0, 0)))
    if OC_pad != OC:
        w_mat = jnp.pad(w_mat, ((0, 0), (0, OC_pad - OC)))
        shift = jnp.pad(shift, (0, OC_pad - OC))

    grid_m = M_pad // tile_m
    vmem_limit = int(max(budget, 16 * 1024 * 1024))

    cost = pl.CostEstimate(
        flops=2 * M_pad * Kdim * OC_pad,
        transcendentals=0,
        bytes_accessed=(M_pad * Kdim * 2 + Kdim * OC_pad * 2
                        + OC_pad * 4 + M_pad * OC_pad * 2),
    )

    # TODO(synk): for very long grids, pipeline_mode=pl.Buffered(3) on the patch
    #             block can hide more DMA latency; default depth 2 kept here.
    out = pl.pallas_call(
        conv_bn_relu_kernel,
        out_shape=jax.ShapeDtypeStruct((M_pad, OC_pad), jnp.bfloat16),
        grid_spec=pltpu.PrefetchScalarGridSpec(
            num_scalar_prefetch=0,
            grid=(grid_m,),
            in_specs=[
                pl.BlockSpec((tile_m, Kdim), lambda i: (i, 0)),   # patch row tile
                pl.BlockSpec((Kdim, OC_pad), lambda i: (0, 0)),   # weights (resident)
                pl.BlockSpec((1, OC_pad), lambda i: (0, 0)),      # folded BN shift
            ],
            out_specs=pl.BlockSpec((tile_m, OC_pad), lambda i: (i, 0)),
        ),
        compiler_params=pltpu.CompilerParams(
            dimension_semantics=("parallel",),   # shards M tiles across TCs on v7x
            vmem_limit_bytes=vmem_limit,
        ),
        cost_estimate=cost,
    )(patches, w_mat, shift.reshape(1, OC_pad))

    # TODO(synk): if the consumer accepts NHWC bf16, skip the slice/transpose/
    #             cast below — each is a full extra HBM pass outside the kernel.
    out = out[:M, :OC].reshape(N, OH, OW, OC)
    return jnp.transpose(out, (0, 3, 1, 2)).astype(jnp.float32)   # back to NCHW


if __name__ == "__main__":
    # small shapes consistent with BasicConv(input_channels=4, output_channels=8, kernel_size=3)
    N, C, H, W = 2, 4, 16, 16
    OC, K = 8, 3

    key = jax.random.PRNGKey(0)
    k_x, k_w, k_b, k_g, k_be, k_m, k_v = jax.random.split(key, 7)

    x = jax.random.normal(k_x, (N, C, H, W), dtype=jnp.float32)

    # deterministic synthetic parameters (shapes from nn.Conv2d / nn.BatchNorm2d)
    weight = 0.1 * jax.random.normal(k_w, (OC, C, K, K), dtype=jnp.float32)
    conv_bias = 0.1 * jax.random.normal(k_b, (OC,), dtype=jnp.float32)
    gamma = 1.0 + 0.1 * jax.random.normal(k_g, (OC,), dtype=jnp.float32)
    beta = 0.1 * jax.random.normal(k_be, (OC,), dtype=jnp.float32)
    running_mean = 0.1 * jax.random.normal(k_m, (OC,), dtype=jnp.float32)
    running_var = jnp.abs(1.0 + 0.1 * jax.random.normal(k_v, (OC,), dtype=jnp.float32))

    # tile_m auto-picked: M = 2*14*14 = 392 -> tile_m=256 -> 2-step parallel grid
    y = basic_conv_forward(x, weight, conv_bias, gamma, beta,
                           running_mean, running_var)
    jax.block_until_ready(y)
    assert y.shape == (N, OC, H - K + 1, W - K + 1)

    # pure-JAX f32 reference (bf16 matmul + bf16 store in the kernel -> loose tol)
    conv = jax.lax.conv_general_dilated(
        x, weight, window_strides=(1, 1), padding="VALID",
        dimension_numbers=("NCHW", "OIHW", "NCHW"))
    conv = conv + conv_bias.reshape(1, OC, 1, 1)
    scale_ref = gamma / jnp.sqrt(running_var + 1e-5)
    ref = jnp.maximum(
        (conv - running_mean.reshape(1, OC, 1, 1)) * scale_ref.reshape(1, OC, 1, 1)
        + beta.reshape(1, OC, 1, 1), 0.0)
    err = float(jnp.max(jnp.abs(y - ref)))
    assert err < 1e-1, f"max abs err {err}"

    print("KERNEL_OK")
</pallas_src>

<mosaic_0001>
module attributes {stable_mosaic.version = 11 : i64} {
  func.func @conv_bn_relu_kernel(%arg0: i32, %arg1: memref<256x36xbf16, #tpu.memory_space<vmem>>, %arg2: memref<36x128xbf16, #tpu.memory_space<vmem>>, %arg3: memref<1x128xf32, #tpu.memory_space<vmem>>, %arg4: memref<256x128xbf16, #tpu.memory_space<vmem>>) attributes {dimension_semantics = [#tpu.dimension_semantics<parallel>], iteration_bounds = array<i64: 2>, scalar_prefetch = 0 : i64, scratch_operands = 0 : i64, tpu.core_type = #tpu.core_type<tc>, window_params = [{transform_indices = @transform_0, window_bounds = array<i64: 256, 36>}, {pipeline_mode = #tpu.pipeline_mode<synchronous>, transform_indices = @transform_1, window_bounds = array<i64: 36, 128>}, {pipeline_mode = #tpu.pipeline_mode<synchronous>, transform_indices = @transform_2, window_bounds = array<i64: 1, 128>}, {transform_indices = @transform_3, window_bounds = array<i64: 256, 128>}]} {
    %c0 = arith.constant 0 : index
    %c0_0 = arith.constant 0 : index
    %0 = vector.load %arg1[%c0, %c0_0] : memref<256x36xbf16, #tpu.memory_space<vmem>>, vector<256x36xbf16>
    %c0_1 = arith.constant 0 : index
    %c0_2 = arith.constant 0 : index
    %1 = vector.load %arg2[%c0_1, %c0_2] : memref<36x128xbf16, #tpu.memory_space<vmem>>, vector<36x128xbf16>
    %cst = arith.constant dense<0.000000e+00> : vector<256x128xf32>
    %2 = tpu.matmul %0, %1, %cst {dimension_numbers = #tpu.dot_dimension_numbers<[1], [0], [0], [1], [0, 0, 1, 1], [], []>} : vector<256x36xbf16>, vector<36x128xbf16>, vector<256x128xf32> -> vector<256x128xf32>
    %c0_3 = arith.constant 0 : index
    %c0_4 = arith.constant 0 : index
    %3 = vector.load %arg3[%c0_3, %c0_4] : memref<1x128xf32, #tpu.memory_space<vmem>>, vector<1x128xf32>
    %4 = vector.broadcast %3 : vector<1x128xf32> to vector<256x128xf32>
    %5 = arith.addf %2, %4 : vector<256x128xf32>
    %cst_5 = arith.constant 0.000000e+00 : f32
    %6 = vector.broadcast %cst_5 : f32 to vector<256x128xf32>
    %7 = arith.maximumf %5, %6 : vector<256x128xf32>
    %8 = arith.truncf %7 : vector<256x128xf32> to vector<256x128xbf16>
    %c0_6 = arith.constant 0 : index
    %c0_7 = arith.constant 0 : index
    %9 = vector.load %arg4[%c0_6, %c0_7] : memref<256x128xbf16, #tpu.memory_space<vmem>>, vector<256x128xbf16>
    tpu.vector_store %arg4[%c0_6, %c0_7], %8 {strides = array<i32>} : memref<256x128xbf16, #tpu.memory_space<vmem>>, vector<256x128xbf16>,
    return
  }
  func.func @transform_0(%arg0: i32) -> (i32, i32) {
    %c0_i32 = arith.constant 0 : i32
    %c0_i32_0 = arith.constant 0 : i32
    return %arg0, %c0_i32 : i32, i32
  }
  func.func @transform_1(%arg0: i32) -> (i32, i32) {
    %c0_i32 = arith.constant 0 : i32
    %c0_i32_0 = arith.constant 0 : i32
    %c0_i32_1 = arith.constant 0 : i32
    return %c0_i32, %c0_i32_0 : i32, i32
  }
  func.func @transform_2(%arg0: i32) -> (i32, i32) {
    %c0_i32 = arith.constant 0 : i32
    %c0_i32_0 = arith.constant 0 : i32
    %c0_i32_1 = arith.constant 0 : i32
    return %c0_i32, %c0_i32_0 : i32, i32
  }
  func.func @transform_3(%arg0: i32) -> (i32, i32) {
    %c0_i32 = arith.constant 0 : i32
    %c0_i32_0 = arith.constant 0 : i32
    return %arg0, %c0_i32 : i32, i32
  }
}

</mosaic_0001>

<bundles_post_ra>
// kernel: tpu_custom_call.1
= control target key start
LH: loop header
LB: loop body
LE: loop exit
PB: predicated region body
PF: predicated region fallthrough
CT: control target
= control target key end

     0   :  { %8 = vsyncpa [#allocation3], 0  ;;  %s1419_s0 = inlined_call_operand.vmem [shape: bf16[512,36], index: 0, kind: input, shape index: {}]   ;;  %s1420_s1 = inlined_call_operand.vmem [shape: bf16[36,128], index: 1, kind: input, shape index: {}]   ;;  %s1421_s2 = inlined_call_operand.vmem [shape: f32[1,128], index: 2, kind: input, shape index: {}]   ;;  %s1422_s3 = inlined_call_operand.hbm [shape: bf16[512,128], index: 3, kind: output, shape index: {}]  }
   0x1   :  { %10 = vsyncpa [#allocation3 + $0x1], 0  ;;  %s1214_s12 = smov 0   ;;  %s1216_s13 = smov 0  }
   0x2   :  { %s1218_s14 = smov 0   ;;  %s1220_s15 = smov 0  }
   0x3 LB: > { %s1235_s16 = sadd.s32 4294967295, %s1189_s15   ;;  %s794_s17 = sadd.s32 4294967294, %s1189_s15   ;;  %s1189_s15 = sphi %s1220_s15, %s1428_s15   ;;  %s1185_s14 = sphi %s1218_s14, %s1427_s14   ;;  %s1181_s13 = sphi %s1216_s13, %s1426_s13   ;;  %s1177_s12 = sphi %s1214_s12, %s1425_s12  }
   0x4   : > { %s1239_s18 = sadd.s32 1, %s1189_s15   ;;  %s91_s19 = sadd.s32 1, %s1185_s14 }
   0x5   : > { %s88_s20 = ssub.s32 %s1189_s15, %s1239_s18  ;;  %p101_p0 = scmp.ne.s32.totalorder %s1185_s14, %s1181_s13 }
   0x6   : > { %p89_p1 = scmp.eq.s32.totalorder %s88_s20, 0  ;;  %p102_p2 = scmp.eq.s32.totalorder %s1235_s16, 1 }
   0x7   : > { %p107_p3 = scmp.ne.s32.totalorder %s1181_s13, %s1177_s12  ;;  %p108_p4 = scmp.eq.s32.totalorder %s794_s17, 1 }
   0x8   : > { %s1250_s21 = scalar_select %p89_p1, %s1185_s14, %s91_s19  }
   0x9   : > { %p1252_p5 = por %p102_p2, %p101_p0  ;;  %p1256_p6 = por %p108_p4, %p107_p3 }
   0xa   : > { %p797_p7 = scmp.ge.s32.totalorder %s1189_s15, 1  ;;  %p141_p8 = scmp.lt.s32.totalorder %s1189_s15, 3 }
   0xc   : > { %p142_p9 = pnand %p797_p7, %p141_p8 }
   0xd   : > { %v1108_v0 = vld [vmem:[%s1420_s1] sm:$0xff] (!%p142_p9)   ;;  %v1109_v1 = vld [vmem:[%s1420_s1 + $0x8] sm:$0xff] (!%p142_p9)   ;;  %s799_s28 = sshll.u32 (!%p142_p9), %s1235_s16, 5  ;;  %v1110_v2 = vld [vmem:[%s1420_s1 + $0x10] ss:$0 sps:$4 sm:$0x33] (!%p142_p9)  }
   0xe   : > { %145 = sbr.rel (%p142_p9) target bundleno = 287 (0x11f), region = 32  ;;  %1021 = vmatprep.subr.bf16.mxu0 (!%p142_p9), %v1108_v0  ;;  %1059 = vmatprep.subr.bf16.mxu1 (!%p142_p9), %v1108_v0  ;;  %p166_p10 = scmp.lt.s32.totalorder (!%p142_p9), %s799_s28, 63  ;;  %vm361_vm0 = vcmask (!%p142_p9), 1041408   ;;  %vm312_vm1 = vcmask (!%p142_p9), 293888   ;;  %v1312_v20 = vld [vmem:[%s1421_s2] ss:$0 sm:$0xff] (!%p142_p9) }
   0xf   : > { %1022 = vmatpush3.bf16.msra.mxu0 (!%p142_p9), %v1108_v0  ;;  %1062 = vmatpush3.bf16.msra.mxu1 (!%p142_p9), %v1108_v0  ;;  %v363_v3 = vsel (!%p142_p9), %vm361_vm0, %v1110_v2, 0  ;;  %s162_s10 = sand.u32 (!%p142_p9), 1, %s1181_s13   ;;  %s906_s19 = sshll.u32 (!%p142_p9), %s1235_s16, 11 }
  0x10   : > { %1023 = vmatprep.subr.bf16.mxu0 (!%p142_p9), %v1109_v1  ;;  %1060 = vmatprep.subr.bf16.mxu1 (!%p142_p9), %v1109_v1  ;;  %s798_s11 = sshll.u32 (!%p142_p9), %s162_s10, 7  ;;  %s1368_s16 = scalar_lea.hbm (!%p142_p9), %s1422_s3, %s906_s19 }
  0x11   : > { %s1325_s17 = scalar_lea.vmem (!%p142_p9), [#allocation2], %s798_s11  ;;  %s1378_s26 = scalar_lea.sflag (!%p142_p9), [#allocation3], %s162_s10 }
  0x12   : > { %s732_s20 = sshll.u32 (!%p142_p9), %s1325_s17, 4  ;;  %s1370_s20 = int_to_ptr.vmem [resolvable:$true] %s732_s20 }
  0x13   : > { %1024 = vmatpush3.bf16.msra.mxu0 (!%p142_p9), %v1109_v1  ;;  %1063 = vmatpush3.bf16.msra.mxu1 (!%p142_p9), %v1109_v1  ;;  %s1127_s27 = scalar_lea.vmem (!%p142_p9), %s1370_s20, 2048 }
  0x14   : > { %1065 = vmatprep.subr.msk.bf16.mxu0 (!%p142_p9), %vm361_vm0, %v1110_v2  ;;  %1066 = vmatprep.subr.msk.bf16.mxu1 (!%p142_p9), %vm361_vm0, %v1110_v2  ;;  %p1128_p11 = scmp.ne.s32.totalorder (!%p142_p9), %s1370_s20, %s1127_s27 }
  0x15   : > { %s1430_s28 = smov (!%p166_p10, %s799_s28), 63 }
  0x16   : > { %s800_s4 = sshll.u32 %s1430_s28, 2  ;;  %p1129_p12 = pnand %p1128_p11, %p1252_p5 }
  0x17   : > { %s1275_s7 = scalar_lea.vmem %s1419_s0, %s800_s4  ;;  %1026 = vmatpush3.bf16.msra.mxu0 %v363_v3  ;;  %1064 = vmatpush3.bf16.msra.mxu1 %v363_v3  ;;  %s1191_s28 = smov [#allocation2]  }
  0x18   : > { %v1111_v4 = vld [vmem:[%s1275_s7] sm:$0xff]   ;;  %v1113_v6 = vld [vmem:[%s1275_s7 + $0x8] sm:$0xff]   ;;  %v1115_v8 = vld [vmem:[%s1275_s7 + $0x10] sm:$0xff]   ;;  %p1130_p13 = pneg %p1129_p12  ;;  %s1131_s29 = sshll.u32 %s1191_s28, 4  ;;  %s1132_s29 = int_to_ptr.vmem [resolvable:$false] %s1131_s29 }
  0x19   : > { %v1112_v5 = vld [vmem:[%s1275_s7 + $0x40] sm:$0xff]   ;;  %1027 = vmatprep.mubr.msk.bf16.mxu0 %vm312_vm1, %v1111_v4  ;;  %v1114_v7 = vld [vmem:[%s1275_s7 + $0x48] sm:$0xff]   ;;  %v1116_v9 = vld [vmem:[%s1275_s7 + $0x50] sm:$0xff]   ;;  %s1133_s30 = scalar_lea.vmem %s1132_s29, 4096  ;;  %p1134_p0 = scmp.lt.s32.totalorder %s1370_s20, %s1132_s29 }
  0x1a   : > { %1043 = vmatprep.mubr.msk.bf16.mxu1 %vm312_vm1, %v1112_v5  ;;  %1028 = vmatmul.mubr.msk.bf16.vlgmr.msra.gmra.mrb[0].mxu0 %vm312_vm1, %v1113_v6  ;;  %v1117_v10 = vld [vmem:[%s1275_s7 + $0x18] sm:$0xff]   ;;  %v1119_v12 = vld [vmem:[%s1275_s7 + $0x20] sm:$0xff]   ;;  %v1121_v14 = vld [vmem:[%s1275_s7 + $0x28] sm:$0xff]   ;;  %p1135_p1 = scmp.lt.s32.totalorder %s1133_s30, %s1127_s27 }
  0x1b   : > { %1044 = vmatmul.mubr.msk.bf16.vlgmr.msra.gmra.mrb[0].mxu1 %vm312_vm1, %v1114_v7  ;;  %1031 = vmatprep.mubr.msk.bf16.mxu0 %vm312_vm1, %v1115_v8  ;;  %v1118_v11 = vld [vmem:[%s1275_s7 + $0x58] sm:$0xff]   ;;  %v1120_v13 = vld [vmem:[%s1275_s7 + $0x60] sm:$0xff]   ;;  %v1122_v15 = vld [vmem:[%s1275_s7 + $0x68] sm:$0xff]  }
  0x1c   : > { %1047 = vmatprep.mubr.msk.bf16.mxu1 %vm312_vm1, %v1116_v9  ;;  %v1123_v16 = vld [vmem:[%s1275_s7 + $0x30] sm:$0xff]   ;;  %v1125_v18 = vld [vmem:[%s1275_s7 + $0x38] sm:$0xff]   ;;  %p1136_p2 = por %p1135_p1, %p1134_p0 }
  0x1d   : > { %v1124_v17 = vld [vmem:[%s1275_s7 + $0x70] sm:$0xff]   ;;  %v1126_v19 = vld [vmem:[%s1275_s7 + $0x78] sm:$0xff]  }
  0x1e   : > { %p1137_p3 = pnand %p1136_p2, %p1130_p13 }
  0x22   : > { %1032 = vmatmul.mubr.msk.bf16.gmra.mrb[4].mxu0 %vm312_vm1, %v1117_v10 }
  0x23   : > { %1048 = vmatmul.mubr.msk.bf16.gmra.mrb[4].mxu1 %vm312_vm1, %v1118_v11  ;;  %1035 = vmatprep.mubr.msk.bf16.mxu0 %vm312_vm1, %v1119_v12 }
  0x24   : > { %1051 = vmatprep.mubr.msk.bf16.mxu1 %vm312_vm1, %v1120_v13 }
  0x2a   : > { %1036 = vmatmul.mubr.msk.bf16.gmra.mrb[8].mxu0 %vm312_vm1, %v1121_v14 }
  0x2b   : > { %1052 = vmatmul.mubr.msk.bf16.gmra.mrb[8].mxu1 %vm312_vm1, %v1122_v15  ;;  %1039 = vmatprep.mubr.msk.bf16.mxu0 %vm312_vm1, %v1123_v16 }
  0x2c   : > { %1055 = vmatprep.mubr.msk.bf16.mxu1 %vm312_vm1, %v1124_v17 }
  0x32   : > { %1040 = vmatmul.mubr.msk.bf16.gmra.mrb[12].mxu0 %vm312_vm1, %v1125_v18 }
  0x33   : > { %1056 = vmatmul.mubr.msk.bf16.gmra.mrb[12].mxu1 %vm312_vm1, %v1126_v19 }
  0xed   : > { %v1029_v21 = vpop.f32.mrb[0].mxu0 }
  0xee   : > { %v1045_v22 = vpop.f32.mrb[0].mxu1  ;;  %v408_v23 = vadd.f32 %v1029_v21, %v1312_v20  ;;  %v399_v25 = vpop.f32.mrb[1].mxu0 }
  0xef   : > { %v472_v24 = vadd.f32 %v1045_v22, %v1312_v20  ;;  %v463_v26 = vpop.f32.mrb[1].mxu1  ;;  %v400_v27 = vadd.f32 %v1312_v20, %v399_v25  ;;  %v1030_v29 = vpop.f32.mrb[2].mxu0 }
  0xf0   : > { %v464_v28 = vadd.f32 %v1312_v20, %v463_v26  ;;  %v1046_v30 = vpop.f32.mrb[2].mxu1  ;;  %v411_v31 = vadd.f32 %v1030_v29, %v1312_v20  ;;  %v402_v33 = vpop.f32.mrb[3].mxu0  ;;  %v528_v37 = vmax.f32 %v408_v23, 0.0 }
  0xf1   : > { %v475_v32 = vadd.f32 %v1046_v30, %v1312_v20  ;;  %v466_v34 = vpop.f32.mrb[3].mxu1  ;;  %v403_v35 = vadd.f32 %v1312_v20, %v402_v33  ;;  %v544_v38 = vmax.f32 %v472_v24, 0.0  ;;  %v526_v41 = vmax.f32 %v400_v27, 0.0 }
  0xf2   : > { %v467_v36 = vadd.f32 %v1312_v20, %v466_v34  ;;  %v529_v39 = vmax.f32 %v411_v31, 0.0  ;;  %v542_v42 = vmax.f32 %v464_v28, 0.0 }
  0xf3   : > { %v545_v40 = vmax.f32 %v475_v32, 0.0  ;;  %v527_v43 = vmax.f32 %v403_v35, 0.0 }
  0xf4   : > { %v543_v44 = vmax.f32 %v467_v36, 0.0  ;;  %v915_v45 = vpack.c.bf16 %v529_v39, %v528_v37 }
  0xf5   : > { %v955_v46 = vpack.c.bf16 %v545_v40, %v544_v38  ;;  %v910_v47 = vpack.c.bf16 %v527_v43, %v526_v41  ;;  %v1033_v49 = vpop.f32.mrb[4].mxu0 }
  0xf6   : > { %v950_v48 = vpack.c.bf16 %v543_v44, %v542_v42  ;;  %v1049_v50 = vpop.f32.mrb[4].mxu1  ;;  %987 = vst [vmem:[%s1325_s17 + $0x8] sm:$0xff] %v915_v45   ;;  %v424_v51 = vadd.f32 %v1033_v49, %v1312_v20  ;;  %v415_v53 = vpop.f32.mrb[5].mxu0 }
  0xf7   : > { %995 = vst [vmem:[%s1325_s17 + $0x48] sm:$0xff] %v955_v46   ;;  %v488_v52 = vadd.f32 %v1049_v50, %v1312_v20  ;;  %v479_v54 = vpop.f32.mrb[5].mxu1  ;;  %911 = vst [vmem:[%s1325_s17] sm:$0xff] %v910_v47   ;;  %v416_v55 = vadd.f32 %v1312_v20, %v415_v53  ;;  %v1034_v57 = vpop.f32.mrb[6].mxu0 }
  0xf8   : > { %994 = vst [vmem:[%s1325_s17 + $0x40] sm:$0xff] %v950_v48   ;;  %v480_v56 = vadd.f32 %v1312_v20, %v479_v54  ;;  %v1050_v58 = vpop.f32.mrb[6].mxu1  ;;  %v427_v59 = vadd.f32 %v1034_v57, %v1312_v20  ;;  %v418_v61 = vpop.f32.mrb[7].mxu0  ;;  %v532_v1 = vmax.f32 %v424_v51, 0.0 }
  0xf9   : > { %v491_v60 = vadd.f32 %v1050_v58, %v1312_v20  ;;  %v482_v62 = vpop.f32.mrb[7].mxu1  ;;  %v419_v63 = vadd.f32 %v1312_v20, %v418_v61  ;;  %v548_v2 = vmax.f32 %v488_v52, 0.0  ;;  %v530_v5 = vmax.f32 %v416_v55, 0.0 }
  0xfa   : > { %v483_v0 = vadd.f32 %v1312_v20, %v482_v62  ;;  %v533_v3 = vmax.f32 %v427_v59, 0.0  ;;  %v546_v6 = vmax.f32 %v480_v56, 0.0 }
  0xfb   : > { %v549_v4 = vmax.f32 %v491_v60, 0.0  ;;  %v531_v7 = vmax.f32 %v419_v63, 0.0 }
  0xfc   : > { %v547_v8 = vmax.f32 %v483_v0, 0.0  ;;  %v925_v9 = vpack.c.bf16 %v533_v3, %v532_v1 }
  0xfd   : > { %v965_v10 = vpack.c.bf16 %v549_v4, %v548_v2  ;;  %v920_v11 = vpack.c.bf16 %v531_v7, %v530_v5  ;;  %v1037_v13 = vpop.f32.mrb[8].mxu0 }
  0xfe   : > { %v960_v12 = vpack.c.bf16 %v547_v8, %v546_v6  ;;  %v1053_v14 = vpop.f32.mrb[8].mxu1  ;;  %989 = vst [vmem:[%s1325_s17 + $0x18] sm:$0xff] %v925_v9   ;;  %v440_v15 = vadd.f32 %v1037_v13, %v1312_v20  ;;  %v431_v17 = vpop.f32.mrb[9].mxu0 }
  0xff   : > { %997 = vst [vmem:[%s1325_s17 + $0x58] sm:$0xff] %v965_v10   ;;  %v504_v16 = vadd.f32 %v1053_v14, %v1312_v20  ;;  %v495_v18 = vpop.f32.mrb[9].mxu1  ;;  %988 = vst [vmem:[%s1325_s17 + $0x10] sm:$0xff] %v920_v11   ;;  %v432_v19 = vadd.f32 %v1312_v20, %v431_v17  ;;  %v1038_v22 = vpop.f32.mrb[10].mxu0 }
 0x100   : > { %996 = vst [vmem:[%s1325_s17 + $0x50] sm:$0xff] %v960_v12   ;;  %v496_v21 = vadd.f32 %v1312_v20, %v495_v18  ;;  %v1054_v23 = vpop.f32.mrb[10].mxu1  ;;  %v443_v24 = vadd.f32 %v1038_v22, %v1312_v20  ;;  %v434_v26 = vpop.f32.mrb[11].mxu0  ;;  %v536_v30 = vmax.f32 %v440_v15, 0.0 }
 0x101   : > { %v507_v25 = vadd.f32 %v1054_v23, %v1312_v20  ;;  %v498_v27 = vpop.f32.mrb[11].mxu1  ;;  %v435_v28 = vadd.f32 %v1312_v20, %v434_v26  ;;  %v552_v31 = vmax.f32 %v504_v16, 0.0  ;;  %v534_v34 = vmax.f32 %v432_v19, 0.0 }
 0x102   : > { %v499_v29 = vadd.f32 %v1312_v20, %v498_v27  ;;  %v537_v32 = vmax.f32 %v443_v24, 0.0  ;;  %v550_v35 = vmax.f32 %v496_v21, 0.0 }
 0x103   : > { %v553_v33 = vmax.f32 %v507_v25, 0.0  ;;  %v535_v36 = vmax.f32 %v435_v28, 0.0 }
 0x104   : > { %v551_v37 = vmax.f32 %v499_v29, 0.0  ;;  %v935_v38 = vpack.c.bf16 %v537_v32, %v536_v30 }
 0x105   : > { %v975_v39 = vpack.c.bf16 %v553_v33, %v552_v31  ;;  %v930_v40 = vpack.c.bf16 %v535_v36, %v534_v34  ;;  %v1041_v42 = vpop.f32.mrb[12].mxu0 }
 0x106   : > { %v970_v41 = vpack.c.bf16 %v551_v37, %v550_v35  ;;  %v1057_v43 = vpop.f32.mrb[12].mxu1  ;;  %991 = vst [vmem:[%s1325_s17 + $0x28] sm:$0xff] %v935_v38   ;;  %v456_v44 = vadd.f32 %v1041_v42, %v1312_v20  ;;  %v447_v46 = vpop.f32.mrb[13].mxu0 }
 0x107   : > { %999 = vst [vmem:[%s1325_s17 + $0x68] sm:$0xff] %v975_v39   ;;  %v520_v45 = vadd.f32 %v1057_v43, %v1312_v20  ;;  %v511_v47 = vpop.f32.mrb[13].mxu1  ;;  %990 = vst [vmem:[%s1325_s17 + $0x20] sm:$0xff] %v930_v40   ;;  %v448_v48 = vadd.f32 %v1312_v20, %v447_v46  ;;  %v1042_v50 = vpop.f32.mrb[14].mxu0 }
 0x108   : > { %998 = vst [vmem:[%s1325_s17 + $0x60] sm:$0xff] %v970_v41   ;;  %v512_v49 = vadd.f32 %v1312_v20, %v511_v47  ;;  %v1058_v51 = vpop.f32.mrb[14].mxu1  ;;  %v459_v52 = vadd.f32 %v1042_v50, %v1312_v20  ;;  %v450_v54 = vpop.f32.mrb[15].mxu0  ;;  %v540_v58 = vmax.f32 %v456_v44, 0.0 }
 0x109   : > { %v523_v53 = vadd.f32 %v1058_v51, %v1312_v20  ;;  %v514_v55 = vpop.f32.mrb[15].mxu1  ;;  %v451_v56 = vadd.f32 %v1312_v20, %v450_v54  ;;  %v556_v59 = vmax.f32 %v520_v45, 0.0  ;;  %v538_v62 = vmax.f32 %v448_v48, 0.0 }
 0x10a   : > { %v515_v57 = vadd.f32 %v1312_v20, %v514_v55  ;;  %v541_v60 = vmax.f32 %v459_v52, 0.0  ;;  %v554_v63 = vmax.f32 %v512_v49, 0.0 }
 0x10b   : > { %v557_v61 = vmax.f32 %v523_v53, 0.0  ;;  %v539_v0 = vmax.f32 %v451_v56, 0.0 }
 0x10c   : > { %v555_v1 = vmax.f32 %v515_v57, 0.0  ;;  %v945_v2 = vpack.c.bf16 %v541_v60, %v540_v58 }
 0x10d   : > { %v985_v3 = vpack.c.bf16 %v557_v61, %v556_v59  ;;  %v940_v20 = vpack.c.bf16 %v539_v0, %v538_v62 }
 0x10e   : > { %v980_v4 = vpack.c.bf16 %v555_v1, %v554_v63  ;;  %993 = vst [vmem:[%s1325_s17 + $0x38] sm:$0xff] %v945_v2  }
 0x10f   : > { %1001 = vst [vmem:[%s1325_s17 + $0x78] sm:$0xff] %v985_v3   ;;  %992 = vst [vmem:[%s1325_s17 + $0x30] sm:$0xff] %v940_v20  }
 0x110   : > { %1000 = vst [vmem:[%s1325_s17 + $0x70] sm:$0xff] %v980_v4  }
 0x111   : > { %1140 = shalt.err (!%p1137_p3)
}
 0x112   : > { %s1141_s4 = scalar_lea.hbm %s1368_s16, 2048  ;;  %s1145_s7 = scalar_lea.hbm %s1422_s3, 4096 }
 0x113   : > { %p1142_p4 = scmp.ne.s32.totalorder %s1368_s16, %s1141_s4  ;;  %p1146_p9 = scmp.lt.u32.totalorder %s1368_s16, %s1422_s3 }
 0x114   : > { %p1147_p10 = scmp.lt.u32.totalorder %s1145_s7, %s1141_s4  ;;  %p1149_p12 = scmp.lt.u32.totalorder %s1141_s4, %s1368_s16 }
 0x115   : > { %p1143_p7 = pnand %p1142_p4, %p1252_p5 }
 0x116   : > { %p1148_p11 = por %p1147_p10, %p1146_p9 }
 0x117   : > { %p1144_p8 = pneg %p1143_p7 }
 0x118   : > { %p1150_p13 = por %p1149_p12, %p1148_p11 }
 0x11a   : > { %p1151_p0 = pnand %p1150_p13, %p1144_p8 }
 0x11c   : > { %1154 = shalt.err (!%p1151_p0)
}
 0x11d   : > { %s1192_s10 = smov 64   ;;  %s1193_s11 = smov 4  }
 0x11e   : > { %1067 = dma.vmem_to_hbm [thread:$0]  (%p1252_p5), %s1370_s20, 2048, %s1368_s16, %s1378_s26, %s1192_s10, %s1192_s10, %s1193_s11  }
 0x11f PF: > { %p1073_p1 = scmp.ge.s32.totalorder %s1189_s15, 2  ;;  %s747_s17 = sand.u32 1, %s1177_s12  }
 0x120   : > { %s748_s19 = scalar_lea.sflag [#allocation3], %s747_s17 }
 0x121   : > { %p1070_p2 = pnand %p1073_p1, %p1256_p6 }
 0x123   : > { %1172 = dma.done.wait (!%p1070_p2), %s748_s19, 2048  }
 0x124   : > { %1174 = vsyncadd (!%p1070_p2), %s748_s19, 4294965248  ;;  %p13_p3 = scmp.ge.s32.totalorder %s1239_s18, 4   ;;  %s1425_s12 = smov %s1181_s13 }
 0x125   : > { %s1426_s13 = smov %s1185_s14  ;;  %s1427_s14 = smov %s1250_s21 }
 0x126   : > { %s1428_s15 = smov %s1239_s18  ;;  %15 = sbr.rel (!%p13_p3) target bundleno = 3 (0x3), region = 67 }
 0x12d   :  { %753 = vsyncpa [#allocation3], 1 }
 0x12e   :  { %755 = vsyncpa [#allocation3 + $0x1], 1 }

</bundles_post_ra>
